<compile_context>
chip_gen: v7x
topology: tpu7x:2x2x1
jax: 0.10.0
libtpu: 0.0.40
codegen_flags: <defaults>
</compile_context>

<pallas_src>
import jax
import jax.numpy as jnp
from jax import lax
from jax.experimental import pallas as pl
from jax.experimental.pallas import tpu as pltpu


def _round_up(x, m):
    return (x + m - 1) // m * m


# ---------------------------------------------------------------------------
# Fused kernel: conv1 (matmul + bias + ReLU) -> VMEM scratch ->
#               in-kernel 3x3/s2 tap gather -> conv2 (matmul + bias + ReLU).
# ---------------------------------------------------------------------------
def _fused_subsampling_call(p1, w1m, b1p, w2m, b2p, *, B, M1, M2, W2, K1, Cp):
    """Returns (B, M2, Cp) float32 with M2 = Ho2 * (Wo2 + 1) flat output rows."""

    def kernel(p1_ref, w1_ref, b1_ref, w2_ref, b2_ref, o_ref, y1_ref):
        # ---- conv1: four phase-plane matmuls into the VMEM-resident activation.
        w1v = w1_ref[...]                                   # (K1, Cp) bf16, resident
        b1v = b1_ref[...]                                   # (1, Cp)  f32
        for p in range(2):                                  # output-row parity
            for q in range(2):                              # output-col parity
                a = jnp.dot(p1_ref[0, p, q], w1v,
                            preferred_element_type=jnp.float32)       # (M1, Cp)
                y1_ref[p, q] = jnp.maximum(a + b1v, 0.0)               # f32 scratch

        # ---- conv2: each 3x3/s2 tap is ONE contiguous slice of a phase plane.
        acc = None
        for kh in range(3):
            for kw in range(3):
                start = (kh // 2) * W2 + (kw // 2)
                tap = y1_ref[kh % 2, kw % 2, pl.ds(start, M2), :]      # (M2, Cp)
                d = jnp.dot(tap.astype(jnp.bfloat16), w2_ref[kh, kw],
                            preferred_element_type=jnp.float32)
                acc = d if acc is None else acc + d
        o_ref[0] = jnp.maximum(acc + b2_ref[...], 0.0).astype(o_ref.dtype)

    return pl.pallas_call(
        kernel,
        out_shape=jax.ShapeDtypeStruct((B, M2, Cp), jnp.float32),
        grid=(B,),
        in_specs=[
            pl.BlockSpec((1, 2, 2, M1, K1), lambda b: (b, 0, 0, 0, 0)),  # conv1 patches
            pl.BlockSpec((K1, Cp), lambda b: (0, 0)),                    # w1 (resident)
            pl.BlockSpec((1, Cp), lambda b: (0, 0)),                     # b1 (resident)
            pl.BlockSpec((3, 3, Cp, Cp), lambda b: (0, 0, 0, 0)),        # w2 (resident)
            pl.BlockSpec((1, Cp), lambda b: (0, 0)),                     # b2 (resident)
        ],
        out_specs=pl.BlockSpec((1, M2, Cp), lambda b: (b, 0, 0)),
        scratch_shapes=[pltpu.VMEM((2, 2, M1, Cp), jnp.float32)],        # conv1 act.
        compiler_params=pltpu.CompilerParams(
            dimension_semantics=("parallel",),          # batch across TCs (v7x)
            vmem_limit_bytes=32 * 1024 * 1024),
    )(p1, w1m, b1p, w2m, b2p)


# ---------------------------------------------------------------------------
# Module forward
# ---------------------------------------------------------------------------
@jax.jit
def conv2d_subsampling_forward(x_nchw, params):
    """x_nchw: (B, Cin, T, D) float32.  Returns (B, T'', Cout*D'') float32."""
    w1, b1, w2, b2 = params
    B, Cin, H, W = x_nchw.shape
    Cout = w1.shape[0]
    k, s = 3, 2
    Ho1, Wo1 = (H - k) // s + 1, (W - k) // s + 1
    Ho2, Wo2 = (Ho1 - k) // s + 1, (Wo1 - k) // s + 1
    # Phase-split conv1-activation plane: Hh x W2 positions per (row, col) parity.
    #   W2 = Wo2 + 1 (== ceil(Wo1/2));  Hh = Ho2 + 2 leaves one spare row so the
    #   flat per-tap slices in the kernel never run off the end of a plane.
    Hh, W2 = Ho2 + 2, Wo2 + 1
    M1, M2 = Hh * W2, Ho2 * W2
    K1 = k * k * Cin
    Cp = _round_up(Cout, 128)         # lane-dense stores; stripped once at the end

    # ---- conv1 im2col (phase-split), built by XLA on the tiny input -----------
    x = jnp.transpose(x_nchw, (0, 2, 3, 1)).astype(jnp.bfloat16)      # NHWC
    cols = [x[:, kh:kh + s * Ho1:s, kw:kw + s * Wo1:s, :]
            for kh in range(k) for kw in range(k)]
    p1 = jnp.concatenate(cols, axis=-1)                               # (B,Ho1,Wo1,K1)
    p1 = jnp.pad(p1, ((0, 0), (0, 2 * Hh - Ho1), (0, 2 * W2 - Wo1), (0, 0)))
    p1 = p1.reshape(B, Hh, 2, W2, 2, K1).transpose(0, 2, 4, 1, 3, 5)  # (B,2,2,Hh,W2,K1)
    p1 = p1.reshape(B, 2, 2, M1, K1)

    # ---- weights / bias: PyTorch layout -> matmul layout, zero-padded to Cp ---
    w1m = jnp.transpose(w1, (2, 3, 1, 0)).reshape(K1, Cout)           # (kh,kw,ci)-major
    w1m = jnp.pad(w1m, ((0, 0), (0, Cp - Cout))).astype(jnp.bfloat16)
    b1p = jnp.pad(b1, (0, Cp - Cout)).astype(jnp.float32).reshape(1, Cp)
    w2m = jnp.transpose(w2, (2, 3, 1, 0))                             # (3,3,Cin,Cout)
    w2m = jnp.pad(w2m, ((0, 0), (0, 0), (0, Cp - Cout), (0, Cp - Cout)))
    w2m = w2m.astype(jnp.bfloat16)                                    # Cin rows zeroed
    b2p = jnp.pad(b2, (0, Cp - Cout)).astype(jnp.float32).reshape(1, Cp)

    out = _fused_subsampling_call(p1, w1m, b1p, w2m, b2p,
                                  B=B, M1=M1, M2=M2, W2=W2, K1=K1, Cp=Cp)

    # (B, Ho2*W2, Cp) -> (B, Ho2, Wo2, Cout): strip width/channel padding once.
    out = out.reshape(B, Ho2, W2, Cp)[:, :, :Wo2, :Cout]
    # PyTorch: (B, C, T'', D'') -> permute(0, 2, 1, 3) -> view(B, T'', C*D'').
    return jnp.transpose(out, (0, 1, 3, 2)).reshape(B, Ho2, Cout * Wo2)


def init_params(key, in_channels, out_channels):
    k1, k2, k3, k4 = jax.random.split(key, 4)
    w1 = jax.random.normal(k1, (out_channels, in_channels, 3, 3), jnp.float32) * 0.1
    b1 = jax.random.normal(k2, (out_channels,), jnp.float32) * 0.1
    w2 = jax.random.normal(k3, (out_channels, out_channels, 3, 3), jnp.float32) * 0.1
    b2 = jax.random.normal(k4, (out_channels,), jnp.float32) * 0.1
    return (w1, b1, w2, b2)


# ---------------------------------------------------------------------------
# Pure-JAX reference following the same bf16-operand / f32-accumulate path.
# (Operands are intentionally bf16 — MXU-native; the reference matches that.)
# ---------------------------------------------------------------------------
def _reference_forward(x_nchw, params):
    w1, b1, w2, b2 = params

    def conv(x, w, b):
        y = lax.conv_general_dilated(
            x.astype(jnp.bfloat16), w.astype(jnp.bfloat16),
            window_strides=(2, 2), padding="VALID",
            dimension_numbers=("NCHW", "OIHW", "NCHW"),
            preferred_element_type=jnp.float32)
        return jnp.maximum(y + b[None, :, None, None], 0.0)

    y = conv(conv(x_nchw, w1, b1), w2, b2)                  # (B, C, T'', D'')
    B, C, T2, D2 = y.shape
    return jnp.transpose(y, (0, 2, 1, 3)).reshape(B, T2, C * D2)


if __name__ == "__main__":
    key = jax.random.PRNGKey(0)
    kx, kp = jax.random.split(key)

    B, Cin, T, D = 2, 4, 16, 16
    Cout = 32
    x = jax.random.normal(kx, (B, Cin, T, D), jnp.float32)
    params = init_params(kp, Cin, Cout)

    out = conv2d_subsampling_forward(x, params)
    out = jax.block_until_ready(out)

    ref = _reference_forward(x, params)
    assert out.shape == ref.shape, (out.shape, ref.shape)
    assert jnp.allclose(out, ref, atol=2e-2, rtol=2e-2), "mismatch vs reference"

    print("KERNEL_OK")
</pallas_src>

<mosaic_0001>
module attributes {stable_mosaic.version = 11 : i64} {
  func.func @kernel(%arg0: i32, %arg1: memref<1x2x2x20x36xbf16, #tpu.memory_space<vmem>>, %arg2: memref<36x128xbf16, #tpu.memory_space<vmem>>, %arg3: memref<1x128xf32, #tpu.memory_space<vmem>>, %arg4: memref<3x3x128x128xbf16, #tpu.memory_space<vmem>>, %arg5: memref<1x128xf32, #tpu.memory_space<vmem>>, %arg6: memref<1x12x128xf32, #tpu.memory_space<vmem>>, %arg7: memref<2x2x20x128xf32, #tpu.memory_space<vmem>>) attributes {dimension_semantics = [#tpu.dimension_semantics<parallel>], iteration_bounds = array<i64: 2>, scalar_prefetch = 0 : i64, scratch_operands = 1 : i64, tpu.core_type = #tpu.core_type<tc>, window_params = [{transform_indices = @transform_0, window_bounds = array<i64: 1, 2, 2, 20, 36>}, {pipeline_mode = #tpu.pipeline_mode<synchronous>, transform_indices = @transform_1, window_bounds = array<i64: 36, 128>}, {pipeline_mode = #tpu.pipeline_mode<synchronous>, transform_indices = @transform_2, window_bounds = array<i64: 1, 128>}, {pipeline_mode = #tpu.pipeline_mode<synchronous>, transform_indices = @transform_3, window_bounds = array<i64: 3, 3, 128, 128>}, {pipeline_mode = #tpu.pipeline_mode<synchronous>, transform_indices = @transform_4, window_bounds = array<i64: 1, 128>}, {transform_indices = @transform_5, window_bounds = array<i64: 1, 12, 128>}]} {
    %c0 = arith.constant 0 : index
    %c0_0 = arith.constant 0 : index
    %0 = vector.load %arg2[%c0, %c0_0] : memref<36x128xbf16, #tpu.memory_space<vmem>>, vector<36x128xbf16>
    %c0_1 = arith.constant 0 : index
    %c0_2 = arith.constant 0 : index
    %1 = vector.load %arg3[%c0_1, %c0_2] : memref<1x128xf32, #tpu.memory_space<vmem>>, vector<1x128xf32>
    %c0_3 = arith.constant 0 : index
    %c0_4 = arith.constant 0 : index
    %c0_5 = arith.constant 0 : index
    %c0_6 = arith.constant 0 : index
    %c0_7 = arith.constant 0 : index
    %2 = vector.load %arg1[%c0_3, %c0_4, %c0_5, %c0_6, %c0_7] : memref<1x2x2x20x36xbf16, #tpu.memory_space<vmem>>, vector<1x1x1x20x36xbf16>
    %3 = vector.shape_cast %2 : vector<1x1x1x20x36xbf16> to vector<20x36xbf16>
    %cst = arith.constant dense<0.000000e+00> : vector<20x128xf32>
    %4 = tpu.matmul %3, %0, %cst {dimension_numbers = #tpu.dot_dimension_numbers<[1], [0], [0], [1], [0, 0, 1, 1], [], []>} : vector<20x36xbf16>, vector<36x128xbf16>, vector<20x128xf32> -> vector<20x128xf32>
    %5 = vector.broadcast %1 : vector<1x128xf32> to vector<20x128xf32>
    %6 = arith.addf %4, %5 : vector<20x128xf32>
    %cst_8 = arith.constant 0.000000e+00 : f32
    %7 = vector.broadcast %cst_8 : f32 to vector<20x128xf32>
    %8 = arith.maximumf %6, %7 : vector<20x128xf32>
    %c0_9 = arith.constant 0 : index
    %c0_10 = arith.constant 0 : index
    %c0_11 = arith.constant 0 : index
    %c0_12 = arith.constant 0 : index
    %9 = vector.load %arg7[%c0_9, %c0_10, %c0_11, %c0_12] : memref<2x2x20x128xf32, #tpu.memory_space<vmem>>, vector<1x1x20x128xf32>
    %10 = vector.shape_cast %9 : vector<1x1x20x128xf32> to vector<20x128xf32>
    %11 = vector.shape_cast %8 : vector<20x128xf32> to vector<1x1x20x128xf32>
    tpu.vector_store %arg7[%c0_9, %c0_10, %c0_11, %c0_12], %11 {strides = array<i32>} : memref<2x2x20x128xf32, #tpu.memory_space<vmem>>, vector<1x1x20x128xf32>,
    %c0_13 = arith.constant 0 : index
    %c0_14 = arith.constant 0 : index
    %c1 = arith.constant 1 : index
    %c0_15 = arith.constant 0 : index
    %c0_16 = arith.constant 0 : index
    %12 = vector.load %arg1[%c0_13, %c0_14, %c1, %c0_15, %c0_16] : memref<1x2x2x20x36xbf16, #tpu.memory_space<vmem>>, vector<1x1x1x20x36xbf16>
    %13 = vector.shape_cast %12 : vector<1x1x1x20x36xbf16> to vector<20x36xbf16>
    %cst_17 = arith.constant dense<0.000000e+00> : vector<20x128xf32>
    %14 = tpu.matmul %13, %0, %cst_17 {dimension_numbers = #tpu.dot_dimension_numbers<[1], [0], [0], [1], [0, 0, 1, 1], [], []>} : vector<20x36xbf16>, vector<36x128xbf16>, vector<20x128xf32> -> vector<20x128xf32>
    %15 = vector.broadcast %1 : vector<1x128xf32> to vector<20x128xf32>
    %16 = arith.addf %14, %15 : vector<20x128xf32>
    %cst_18 = arith.constant 0.000000e+00 : f32
    %17 = vector.broadcast %cst_18 : f32 to vector<20x128xf32>
    %18 = arith.maximumf %16, %17 : vector<20x128xf32>
    %c0_19 = arith.constant 0 : index
    %c1_20 = arith.constant 1 : index
    %c0_21 = arith.constant 0 : index
    %c0_22 = arith.constant 0 : index
    %19 = vector.load %arg7[%c0_19, %c1_20, %c0_21, %c0_22] : memref<2x2x20x128xf32, #tpu.memory_space<vmem>>, vector<1x1x20x128xf32>
    %20 = vector.shape_cast %19 : vector<1x1x20x128xf32> to vector<20x128xf32>
    %21 = vector.shape_cast %18 : vector<20x128xf32> to vector<1x1x20x128xf32>
    tpu.vector_store %arg7[%c0_19, %c1_20, %c0_21, %c0_22], %21 {strides = array<i32>} : memref<2x2x20x128xf32, #tpu.memory_space<vmem>>, vector<1x1x20x128xf32>,
    %c0_23 = arith.constant 0 : index
    %c1_24 = arith.constant 1 : index
    %c0_25 = arith.constant 0 : index
    %c0_26 = arith.constant 0 : index
    %c0_27 = arith.constant 0 : index
    %22 = vector.load %arg1[%c0_23, %c1_24, %c0_25, %c0_26, %c0_27] : memref<1x2x2x20x36xbf16, #tpu.memory_space<vmem>>, vector<1x1x1x20x36xbf16>
    %23 = vector.shape_cast %22 : vector<1x1x1x20x36xbf16> to vector<20x36xbf16>
    %cst_28 = arith.constant dense<0.000000e+00> : vector<20x128xf32>
    %24 = tpu.matmul %23, %0, %cst_28 {dimension_numbers = #tpu.dot_dimension_numbers<[1], [0], [0], [1], [0, 0, 1, 1], [], []>} : vector<20x36xbf16>, vector<36x128xbf16>, vector<20x128xf32> -> vector<20x128xf32>
    %25 = vector.broadcast %1 : vector<1x128xf32> to vector<20x128xf32>
    %26 = arith.addf %24, %25 : vector<20x128xf32>
    %cst_29 = arith.constant 0.000000e+00 : f32
    %27 = vector.broadcast %cst_29 : f32 to vector<20x128xf32>
    %28 = arith.maximumf %26, %27 : vector<20x128xf32>
    %c1_30 = arith.constant 1 : index
    %c0_31 = arith.constant 0 : index
    %c0_32 = arith.constant 0 : index
    %c0_33 = arith.constant 0 : index
    %29 = vector.load %arg7[%c1_30, %c0_31, %c0_32, %c0_33] : memref<2x2x20x128xf32, #tpu.memory_space<vmem>>, vector<1x1x20x128xf32>
    %30 = vector.shape_cast %29 : vector<1x1x20x128xf32> to vector<20x128xf32>
    %31 = vector.shape_cast %28 : vector<20x128xf32> to vector<1x1x20x128xf32>
    tpu.vector_store %arg7[%c1_30, %c0_31, %c0_32, %c0_33], %31 {strides = array<i32>} : memref<2x2x20x128xf32, #tpu.memory_space<vmem>>, vector<1x1x20x128xf32>,
    %c0_34 = arith.constant 0 : index
    %c1_35 = arith.constant 1 : index
    %c1_36 = arith.constant 1 : index
    %c0_37 = arith.constant 0 : index
    %c0_38 = arith.constant 0 : index
    %32 = vector.load %arg1[%c0_34, %c1_35, %c1_36, %c0_37, %c0_38] : memref<1x2x2x20x36xbf16, #tpu.memory_space<vmem>>, vector<1x1x1x20x36xbf16>
    %33 = vector.shape_cast %32 : vector<1x1x1x20x36xbf16> to vector<20x36xbf16>
    %cst_39 = arith.constant dense<0.000000e+00> : vector<20x128xf32>
    %34 = tpu.matmul %33, %0, %cst_39 {dimension_numbers = #tpu.dot_dimension_numbers<[1], [0], [0], [1], [0, 0, 1, 1], [], []>} : vector<20x36xbf16>, vector<36x128xbf16>, vector<20x128xf32> -> vector<20x128xf32>
    %35 = vector.broadcast %1 : vector<1x128xf32> to vector<20x128xf32>
    %36 = arith.addf %34, %35 : vector<20x128xf32>
    %cst_40 = arith.constant 0.000000e+00 : f32
    %37 = vector.broadcast %cst_40 : f32 to vector<20x128xf32>
    %38 = arith.maximumf %36, %37 : vector<20x128xf32>
    %c1_41 = arith.constant 1 : index
    %c1_42 = arith.constant 1 : index
    %c0_43 = arith.constant 0 : index
    %c0_44 = arith.constant 0 : index
    %39 = vector.load %arg7[%c1_41, %c1_42, %c0_43, %c0_44] : memref<2x2x20x128xf32, #tpu.memory_space<vmem>>, vector<1x1x20x128xf32>
    %40 = vector.shape_cast %39 : vector<1x1x20x128xf32> to vector<20x128xf32>
    %41 = vector.shape_cast %38 : vector<20x128xf32> to vector<1x1x20x128xf32>
    tpu.vector_store %arg7[%c1_41, %c1_42, %c0_43, %c0_44], %41 {strides = array<i32>} : memref<2x2x20x128xf32, #tpu.memory_space<vmem>>, vector<1x1x20x128xf32>,
    %c0_45 = arith.constant 0 : index
    %c0_46 = arith.constant 0 : index
    %c0_47 = arith.constant 0 : index
    %c0_48 = arith.constant 0 : index
    %42 = vector.load %arg7[%c0_45, %c0_46, %c0_47, %c0_48] : memref<2x2x20x128xf32, #tpu.memory_space<vmem>>, vector<1x1x12x128xf32>
    %43 = vector.shape_cast %42 : vector<1x1x12x128xf32> to vector<12x128xf32>
    %44 = arith.truncf %43 : vector<12x128xf32> to vector<12x128xbf16>
    %c0_49 = arith.constant 0 : index
    %c0_50 = arith.constant 0 : index
    %c0_51 = arith.constant 0 : index
    %c0_52 = arith.constant 0 : index
    %45 = vector.load %arg4[%c0_49, %c0_50, %c0_51, %c0_52] : memref<3x3x128x128xbf16, #tpu.memory_space<vmem>>, vector<1x1x128x128xbf16>
    %46 = vector.shape_cast %45 : vector<1x1x128x128xbf16> to vector<128x128xbf16>
    %cst_53 = arith.constant dense<0.000000e+00> : vector<12x128xf32>
    %47 = tpu.matmul %44, %46, %cst_53 {dimension_numbers = #tpu.dot_dimension_numbers<[1], [0], [0], [1], [0, 0, 1, 1], [], []>} : vector<12x128xbf16>, vector<128x128xbf16>, vector<12x128xf32> -> vector<12x128xf32>
    %c0_54 = arith.constant 0 : index
    %c1_55 = arith.constant 1 : index
    %c0_56 = arith.constant 0 : index
    %c0_57 = arith.constant 0 : index
    %48 = vector.load %arg7[%c0_54, %c1_55, %c0_56, %c0_57] : memref<2x2x20x128xf32, #tpu.memory_space<vmem>>, vector<1x1x12x128xf32>
    %49 = vector.shape_cast %48 : vector<1x1x12x128xf32> to vector<12x128xf32>
    %50 = arith.truncf %49 : vector<12x128xf32> to vector<12x128xbf16>
    %c0_58 = arith.constant 0 : index
    %c1_59 = arith.constant 1 : index
    %c0_60 = arith.constant 0 : index
    %c0_61 = arith.constant 0 : index
    %51 = vector.load %arg4[%c0_58, %c1_59, %c0_60, %c0_61] : memref<3x3x128x128xbf16, #tpu.memory_space<vmem>>, vector<1x1x128x128xbf16>
    %52 = vector.shape_cast %51 : vector<1x1x128x128xbf16> to vector<128x128xbf16>
    %cst_62 = arith.constant dense<0.000000e+00> : vector<12x128xf32>
    %53 = tpu.matmul %50, %52, %cst_62 {dimension_numbers = #tpu.dot_dimension_numbers<[1], [0], [0], [1], [0, 0, 1, 1], [], []>} : vector<12x128xbf16>, vector<128x128xbf16>, vector<12x128xf32> -> vector<12x128xf32>
    %54 = arith.addf %47, %53 : vector<12x128xf32>
    %c0_63 = arith.constant 0 : index
    %c0_64 = arith.constant 0 : index
    %c1_65 = arith.constant 1 : index
    %c0_66 = arith.constant 0 : index
    %55 = vector.load %arg7[%c0_63, %c0_64, %c1_65, %c0_66] : memref<2x2x20x128xf32, #tpu.memory_space<vmem>>, vector<1x1x12x128xf32>
    %56 = vector.shape_cast %55 : vector<1x1x12x128xf32> to vector<12x128xf32>
    %57 = arith.truncf %56 : vector<12x128xf32> to vector<12x128xbf16>
    %c0_67 = arith.constant 0 : index
    %c2 = arith.constant 2 : index
    %c0_68 = arith.constant 0 : index
    %c0_69 = arith.constant 0 : index
    %58 = vector.load %arg4[%c0_67, %c2, %c0_68, %c0_69] : memref<3x3x128x128xbf16, #tpu.memory_space<vmem>>, vector<1x1x128x128xbf16>
    %59 = vector.shape_cast %58 : vector<1x1x128x128xbf16> to vector<128x128xbf16>
    %cst_70 = arith.constant dense<0.000000e+00> : vector<12x128xf32>
    %60 = tpu.matmul %57, %59, %cst_70 {dimension_numbers = #tpu.dot_dimension_numbers<[1], [0], [0], [1], [0, 0, 1, 1], [], []>} : vector<12x128xbf16>, vector<128x128xbf16>, vector<12x128xf32> -> vector<12x128xf32>
    %61 = arith.addf %54, %60 : vector<12x128xf32>
    %c1_71 = arith.constant 1 : index
    %c0_72 = arith.constant 0 : index
    %c0_73 = arith.constant 0 : index
    %c0_74 = arith.constant 0 : index
    %62 = vector.load %arg7[%c1_71, %c0_72, %c0_73, %c0_74] : memref<2x2x20x128xf32, #tpu.memory_space<vmem>>, vector<1x1x12x128xf32>
    %63 = vector.shape_cast %62 : vector<1x1x12x128xf32> to vector<12x128xf32>
    %64 = arith.truncf %63 : vector<12x128xf32> to vector<12x128xbf16>
    %c1_75 = arith.constant 1 : index
    %c0_76 = arith.constant 0 : index
    %c0_77 = arith.constant 0 : index
    %c0_78 = arith.constant 0 : index
    %65 = vector.load %arg4[%c1_75, %c0_76, %c0_77, %c0_78] : memref<3x3x128x128xbf16, #tpu.memory_space<vmem>>, vector<1x1x128x128xbf16>
    %66 = vector.shape_cast %65 : vector<1x1x128x128xbf16> to vector<128x128xbf16>
    %cst_79 = arith.constant dense<0.000000e+00> : vector<12x128xf32>
    %67 = tpu.matmul %64, %66, %cst_79 {dimension_numbers = #tpu.dot_dimension_numbers<[1], [0], [0], [1], [0, 0, 1, 1], [], []>} : vector<12x128xbf16>, vector<128x128xbf16>, vector<12x128xf32> -> vector<12x128xf32>
    %68 = arith.addf %61, %67 : vector<12x128xf32>
    %c1_80 = arith.constant 1 : index
    %c1_81 = arith.constant 1 : index
    %c0_82 = arith.constant 0 : index
    %c0_83 = arith.constant 0 : index
    %69 = vector.load %arg7[%c1_80, %c1_81, %c0_82, %c0_83] : memref<2x2x20x128xf32, #tpu.memory_space<vmem>>, vector<1x1x12x128xf32>
    %70 = vector.shape_cast %69 : vector<1x1x12x128xf32> to vector<12x128xf32>
    %71 = arith.truncf %70 : vector<12x128xf32> to vector<12x128xbf16>
    %c1_84 = arith.constant 1 : index
    %c1_85 = arith.constant 1 : index
    %c0_86 = arith.constant 0 : index
    %c0_87 = arith.constant 0 : index
    %72 = vector.load %arg4[%c1_84, %c1_85, %c0_86, %c0_87] : memref<3x3x128x128xbf16, #tpu.memory_space<vmem>>, vector<1x1x128x128xbf16>
    %73 = vector.shape_cast %72 : vector<1x1x128x128xbf16> to vector<128x128xbf16>
    %cst_88 = arith.constant dense<0.000000e+00> : vector<12x128xf32>
    %74 = tpu.matmul %71, %73, %cst_88 {dimension_numbers = #tpu.dot_dimension_numbers<[1], [0], [0], [1], [0, 0, 1, 1], [], []>} : vector<12x128xbf16>, vector<128x128xbf16>, vector<12x128xf32> -> vector<12x128xf32>
    %75 = arith.addf %68, %74 : vector<12x128xf32>
    %c1_89 = arith.constant 1 : index
    %c0_90 = arith.constant 0 : index
    %c1_91 = arith.constant 1 : index
    %c0_92 = arith.constant 0 : index
    %76 = vector.load %arg7[%c1_89, %c0_90, %c1_91, %c0_92] : memref<2x2x20x128xf32, #tpu.memory_space<vmem>>, vector<1x1x12x128xf32>
    %77 = vector.shape_cast %76 : vector<1x1x12x128xf32> to vector<12x128xf32>
    %78 = arith.truncf %77 : vector<12x128xf32> to vector<12x128xbf16>
    %c1_93 = arith.constant 1 : index
    %c2_94 = arith.constant 2 : index
    %c0_95 = arith.constant 0 : index
    %c0_96 = arith.constant 0 : index
    %79 = vector.load %arg4[%c1_93, %c2_94, %c0_95, %c0_96] : memref<3x3x128x128xbf16, #tpu.memory_space<vmem>>, vector<1x1x128x128xbf16>
    %80 = vector.shape_cast %79 : vector<1x1x128x128xbf16> to vector<128x128xbf16>
    %cst_97 = arith.constant dense<0.000000e+00> : vector<12x128xf32>
    %81 = tpu.matmul %78, %80, %cst_97 {dimension_numbers = #tpu.dot_dimension_numbers<[1], [0], [0], [1], [0, 0, 1, 1], [], []>} : vector<12x128xbf16>, vector<128x128xbf16>, vector<12x128xf32> -> vector<12x128xf32>
    %82 = arith.addf %75, %81 : vector<12x128xf32>
    %c0_98 = arith.constant 0 : index
    %c0_99 = arith.constant 0 : index
    %c4 = arith.constant 4 : index
    %c0_100 = arith.constant 0 : index
    %83 = vector.load %arg7[%c0_98, %c0_99, %c4, %c0_100] : memref<2x2x20x128xf32, #tpu.memory_space<vmem>>, vector<1x1x12x128xf32>
    %84 = vector.shape_cast %83 : vector<1x1x12x128xf32> to vector<12x128xf32>
    %85 = arith.truncf %84 : vector<12x128xf32> to vector<12x128xbf16>
    %c2_101 = arith.constant 2 : index
    %c0_102 = arith.constant 0 : index
    %c0_103 = arith.constant 0 : index
    %c0_104 = arith.constant 0 : index
    %86 = vector.load %arg4[%c2_101, %c0_102, %c0_103, %c0_104] : memref<3x3x128x128xbf16, #tpu.memory_space<vmem>>, vector<1x1x128x128xbf16>
    %87 = vector.shape_cast %86 : vector<1x1x128x128xbf16> to vector<128x128xbf16>
    %cst_105 = arith.constant dense<0.000000e+00> : vector<12x128xf32>
    %88 = tpu.matmul %85, %87, %cst_105 {dimension_numbers = #tpu.dot_dimension_numbers<[1], [0], [0], [1], [0, 0, 1, 1], [], []>} : vector<12x128xbf16>, vector<128x128xbf16>, vector<12x128xf32> -> vector<12x128xf32>
    %89 = arith.addf %82, %88 : vector<12x128xf32>
    %c0_106 = arith.constant 0 : index
    %c1_107 = arith.constant 1 : index
    %c4_108 = arith.constant 4 : index
    %c0_109 = arith.constant 0 : index
    %90 = vector.load %arg7[%c0_106, %c1_107, %c4_108, %c0_109] : memref<2x2x20x128xf32, #tpu.memory_space<vmem>>, vector<1x1x12x128xf32>
    %91 = vector.shape_cast %90 : vector<1x1x12x128xf32> to vector<12x128xf32>
    %92 = arith.truncf %91 : vector<12x128xf32> to vector<12x128xbf16>
    %c2_110 = arith.constant 2 : index
    %c1_111 = arith.constant 1 : index
    %c0_112 = arith.constant 0 : index
    %c0_113 = arith.constant 0 : index
    %93 = vector.load %arg4[%c2_110, %c1_111, %c0_112, %c0_113] : memref<3x3x128x128xbf16, #tpu.memory_space<vmem>>, vector<1x1x128x128xbf16>
    %94 = vector.shape_cast %93 : vector<1x1x128x128xbf16> to vector<128x128xbf16>
    %cst_114 = arith.constant dense<0.000000e+00> : vector<12x128xf32>
    %95 = tpu.matmul %92, %94, %cst_114 {dimension_numbers = #tpu.dot_dimension_numbers<[1], [0], [0], [1], [0, 0, 1, 1], [], []>} : vector<12x128xbf16>, vector<128x128xbf16>, vector<12x128xf32> -> vector<12x128xf32>
    %96 = arith.addf %89, %95 : vector<12x128xf32>
    %c0_115 = arith.constant 0 : index
    %c0_116 = arith.constant 0 : index
    %c5 = arith.constant 5 : index
    %c0_117 = arith.constant 0 : index
    %97 = vector.load %arg7[%c0_115, %c0_116, %c5, %c0_117] : memref<2x2x20x128xf32, #tpu.memory_space<vmem>>, vector<1x1x12x128xf32>
    %98 = vector.shape_cast %97 : vector<1x1x12x128xf32> to vector<12x128xf32>
    %99 = arith.truncf %98 : vector<12x128xf32> to vector<12x128xbf16>
    %c2_118 = arith.constant 2 : index
    %c2_119 = arith.constant 2 : index
    %c0_120 = arith.constant 0 : index
    %c0_121 = arith.constant 0 : index
    %100 = vector.load %arg4[%c2_118, %c2_119, %c0_120, %c0_121] : memref<3x3x128x128xbf16, #tpu.memory_space<vmem>>, vector<1x1x128x128xbf16>
    %101 = vector.shape_cast %100 : vector<1x1x128x128xbf16> to vector<128x128xbf16>
    %cst_122 = arith.constant dense<0.000000e+00> : vector<12x128xf32>
    %102 = tpu.matmul %99, %101, %cst_122 {dimension_numbers = #tpu.dot_dimension_numbers<[1], [0], [0], [1], [0, 0, 1, 1], [], []>} : vector<12x128xbf16>, vector<128x128xbf16>, vector<12x128xf32> -> vector<12x128xf32>
    %103 = arith.addf %96, %102 : vector<12x128xf32>
    %c0_123 = arith.constant 0 : index
    %c0_124 = arith.constant 0 : index
    %104 = vector.load %arg5[%c0_123, %c0_124] : memref<1x128xf32, #tpu.memory_space<vmem>>, vector<1x128xf32>
    %105 = vector.broadcast %104 : vector<1x128xf32> to vector<12x128xf32>
    %106 = arith.addf %103, %105 : vector<12x128xf32>
    %cst_125 = arith.constant 0.000000e+00 : f32
    %107 = vector.broadcast %cst_125 : f32 to vector<12x128xf32>
    %108 = arith.maximumf %106, %107 : vector<12x128xf32>
    %c0_126 = arith.constant 0 : index
    %c0_127 = arith.constant 0 : index
    %c0_128 = arith.constant 0 : index
    %109 = vector.load %arg6[%c0_126, %c0_127, %c0_128] : memref<1x12x128xf32, #tpu.memory_space<vmem>>, vector<1x12x128xf32>
    %110 = vector.shape_cast %109 : vector<1x12x128xf32> to vector<12x128xf32>
    %111 = vector.shape_cast %108 : vector<12x128xf32> to vector<1x12x128xf32>
    tpu.vector_store %arg6[%c0_126, %c0_127, %c0_128], %111 {strides = array<i32>} : memref<1x12x128xf32, #tpu.memory_space<vmem>>, vector<1x12x128xf32>,
    return
  }
  func.func @transform_0(%arg0: i32) -> (i32, i32, i32, i32, i32) {
    %c0_i32 = arith.constant 0 : i32
    %c0_i32_0 = arith.constant 0 : i32
    %c0_i32_1 = arith.constant 0 : i32
    %c0_i32_2 = arith.constant 0 : i32
    %c0_i32_3 = arith.constant 0 : i32
    return %arg0, %c0_i32, %c0_i32_0, %c0_i32_1, %c0_i32_2 : i32, i32, i32, i32, i32
  }
  func.func @transform_1(%arg0: i32) -> (i32, i32) {
    %c0_i32 = arith.constant 0 : i32
    %c0_i32_0 = arith.constant 0 : i32
    %c0_i32_1 = arith.constant 0 : i32
    return %c0_i32, %c0_i32_0 : i32, i32
  }
  func.func @transform_2(%arg0: i32) -> (i32, i32) {
    %c0_i32 = arith.constant 0 : i32
    %c0_i32_0 = arith.constant 0 : i32
    %c0_i32_1 = arith.constant 0 : i32
    return %c0_i32, %c0_i32_0 : i32, i32
  }
  func.func @transform_3(%arg0: i32) -> (i32, i32, i32, i32) {
    %c0_i32 = arith.constant 0 : i32
    %c0_i32_0 = arith.constant 0 : i32
    %c0_i32_1 = arith.constant 0 : i32
    %c0_i32_2 = arith.constant 0 : i32
    %c0_i32_3 = arith.constant 0 : i32
    return %c0_i32, %c0_i32_0, %c0_i32_1, %c0_i32_2 : i32, i32, i32, i32
  }
  func.func @transform_4(%arg0: i32) -> (i32, i32) {
    %c0_i32 = arith.constant 0 : i32
    %c0_i32_0 = arith.constant 0 : i32
    %c0_i32_1 = arith.constant 0 : i32
    return %c0_i32, %c0_i32_0 : i32, i32
  }
  func.func @transform_5(%arg0: i32) -> (i32, i32, i32) {
    %c0_i32 = arith.constant 0 : i32
    %c0_i32_0 = arith.constant 0 : i32
    %c0_i32_1 = arith.constant 0 : i32
    return %arg0, %c0_i32, %c0_i32_0 : i32, i32, i32
  }
}

</mosaic_0001>

<bundles_post_ra>
// kernel: conv2d_subsampling_forward.1
= control target key start
LH: loop header
LB: loop body
LE: loop exit
PB: predicated region body
PF: predicated region fallthrough
CT: control target
= control target key end

     0   :  { %s2310_s18 = smov 0   ;;  %s2687_s0 = inlined_call_operand.vmem [shape: bf16[2,2,2,20,36], index: 0, kind: input, shape index: {}]   ;;  %s2688_s1 = inlined_call_operand.vmem [shape: bf16[36,128], index: 1, kind: input, shape index: {}]   ;;  %s2689_s2 = inlined_call_operand.vmem [shape: f32[1,128], index: 2, kind: input, shape index: {}]   ;;  %s2690_s3 = inlined_call_operand.vmem [shape: bf16[3,3,128,128], index: 3, kind: input, shape index: {}]   ;;  %s2691_s4 = inlined_call_operand.vmem [shape: f32[1,128], index: 4, kind: input, shape index: {}]   ;;  %s2692_s5 = inlined_call_operand.vmem [shape: f32[2,12,128], index: 5, kind: output, shape index: {}]  }
   0x1 LB: > { %s1610_s19 = sadd.s32 4294967295, %s2276_s18   ;;  %p1614_p0 = scmp.ge.s32.totalorder %s2276_s18, 1  ;;  %s2276_s18 = sphi %s2310_s18, %s15_s18  }
   0x2   : > { %p187_p1 = scmp.lt.s32.totalorder %s2276_s18, 3 }
   0x4   : > { %p188_p2 = pnand %p1614_p0, %p187_p1 }
   0x5   : > { %v2187_v0 = vld [vmem:[%s2688_s1] sm:$0xff] (!%p188_p2)   ;;  %v2188_v1 = vld [vmem:[%s2688_s1 + $0x8] sm:$0xff] (!%p188_p2)   ;;  %p215_p3 = scmp.lt.s32.totalorder (!%p188_p2), %s1610_s19, 1  ;;  %v2189_v2 = vld [vmem:[%s2688_s1 + $0x10] ss:$0 sps:$4 sm:$0x33] (!%p188_p2)  }
   0x6   : > { %191 = sbr.rel (%p188_p2) target bundleno = 609 (0x261), region = 40  ;;  %1952 = vmatprep.subr.bf16.mxu1 (!%p188_p2), %v2187_v0  ;;  %1972 = vmatprep.subr.bf16.mxu0 (!%p188_p2), %v2187_v0  ;;  %vm271_vm0 = vcmask (!%p188_p2), 1041408   ;;  %vm264_vm1 = vcmask (!%p188_p2), 293888   ;;  %v2278_v8 = vmov (!%p188_p2), 0.0   ;;  %v2201_v10 = vld [vmem:[%s2690_s3 + $0x40] sm:$0xff] (!%p188_p2)   ;;  %v2199_v15 = vld [vmem:[%s2690_s3 + $0x8] sm:$0xff] (!%p188_p2)  }
   0x7   : > { %1953 = vmatpush3.bf16.msra.mxu1 (!%p188_p2), %v2187_v0  ;;  %1973 = vmatpush3.bf16.msra.mxu0 (!%p188_p2), %v2187_v0  ;;  %v273_v3 = vsel (!%p188_p2), %vm271_vm0, %v2189_v2, 0  ;;  %v2198_v14 = vld [vmem:[%s2690_s3] sm:$0xff] (!%p188_p2)   ;;  %v2200_v16 = vld [vmem:[%s2690_s3 + $0x10] sm:$0xff] (!%p188_p2)   ;;  %v2202_v17 = vld [vmem:[%s2690_s3 + $0x18] sm:$0xff] (!%p188_p2)   ;;  %vm2279_vm2 = vmmov (!%p188_p2), 0  }
   0x8   : > { %1954 = vmatprep.subr.bf16.mxu1 (!%p188_p2), %v2188_v1  ;;  %1974 = vmatprep.subr.bf16.mxu0 (!%p188_p2), %v2188_v1  ;;  %v2203_v18 = vld [vmem:[%s2690_s3 + $0x48] sm:$0xff] (!%p188_p2)   ;;  %v2204_v19 = vld [vmem:[%s2690_s3 + $0x20] sm:$0xff] (!%p188_p2)   ;;  %v2205_v20 = vld [vmem:[%s2690_s3 + $0x50] sm:$0xff] (!%p188_p2)  }
   0x9   : > { %v2206_v21 = vld [vmem:[%s2690_s3 + $0x28] sm:$0xff] (!%p188_p2)   ;;  %v2207_v22 = vld [vmem:[%s2690_s3 + $0x58] sm:$0xff] (!%p188_p2)   ;;  %v2208_v23 = vld [vmem:[%s2690_s3 + $0x30] sm:$0xff] (!%p188_p2)  }
   0xa   : > { %v2209_v24 = vld [vmem:[%s2690_s3 + $0x60] sm:$0xff] (!%p188_p2)   ;;  %v2210_v25 = vld [vmem:[%s2690_s3 + $0x38] sm:$0xff] (!%p188_p2)   ;;  %v2211_v26 = vld [vmem:[%s2690_s3 + $0x68] sm:$0xff] (!%p188_p2)  }
   0xb   : > { %1955 = vmatpush3.bf16.msra.mxu1 (!%p188_p2), %v2188_v1  ;;  %1975 = vmatpush3.bf16.msra.mxu0 (!%p188_p2), %v2188_v1  ;;  %v2213_v27 = vld [vmem:[%s2690_s3 + $0x70] sm:$0xff] (!%p188_p2)   ;;  %v2215_v28 = vld [vmem:[%s2690_s3 + $0x78] sm:$0xff] (!%p188_p2)   ;;  %v1618_v29 = vld [vmem:[%s2689_s2] ss:$0 sm:$0xff] (!%p188_p2) }
   0xc   : > { %2172 = vmatprep.subr.msk.bf16.mxu1 (!%p188_p2), %vm271_vm0, %v2189_v2  ;;  %2174 = vmatprep.subr.msk.bf16.mxu0 (!%p188_p2), %vm271_vm0, %v2189_v2  ;;  %v2212_v54 = vld [vmem:[%s2690_s3 + $0xc0] sm:$0xff] (!%p188_p2)   ;;  %v2214_v59 = vld [vmem:[%s2690_s3 + $0xc8] sm:$0xff] (!%p188_p2)   ;;  %v2216_v60 = vld [vmem:[%s2690_s3 + $0xd0] sm:$0xff] (!%p188_p2)  }
   0xd   : > { %s2694_s19 = smov (!%p215_p3, %s1610_s19), 1 }
   0xe   : > { %s2176_s26 = smul.u32 48, %s2694_s19  ;;  %s1850_s15 = sshll.u32 %s2694_s19, 4 }
   0xf   : > { %1957 = vmatpush3.bf16.msra.mxu1 %v273_v3  ;;  %1977 = vmatpush3.bf16.msra.mxu0 %v273_v3  ;;  %s224_s20 = scalar_lea.vmem %s2692_s5, %s1850_s15 }
  0x10   : > { %s2333_s29 = scalar_lea.vmem %s2687_s0, %s2176_s26  ;;  %1962 = vmatprep.subr.bf16.mxu1 %v2187_v0  ;;  %1992 = vmatprep.subr.bf16.mxu0 %v2278_v8 }
  0x11   : > { %v2190_v4 = vld [vmem:[%s2333_s29] sm:$0xff]   ;;  %v2191_v5 = vld [vmem:[%s2333_s29 + $0x8] ss:$0 sps:$4 sm:$0x33]   ;;  %v2192_v6 = vld [vmem:[%s2333_s29 + $0xc] sm:$0xff]  }
  0x12   : > { %1958 = vmatprep.mubr.msk.bf16.mxu1 %vm264_vm1, %v2190_v4  ;;  %v2194_v7 = vld [vmem:[%s2333_s29 + $0x18] sm:$0xff]   ;;  %v2195_v9 = vld [vmem:[%s2333_s29 + $0x20] ss:$0 sps:$4 sm:$0x33]   ;;  %v2196_v12 = vld [vmem:[%s2333_s29 + $0x24] sm:$0xff]  }
  0x13   : > { %1978 = vmatprep.mubr.msk.bf16.mxu0 %vm264_vm1, %v2194_v7  ;;  %1959 = vmatmul.mubr.msk.bf16.vlgmr.msra.gmra.mrb[0].mxu1 %vm264_vm1, %v2191_v5  ;;  %v2193_v11 = vld [vmem:[%s2333_s29 + $0x14] ss:$0 sps:$4 sm:$0x33]   ;;  %v2197_v13 = vld [vmem:[%s2333_s29 + $0x2c] ss:$0 sps:$4 sm:$0x33]  }
  0x14   : > { %1963 = vmatpush3.bf16.msra.mxu1 %v2187_v0  ;;  %1968 = vmatprep.mubr.msk.bf16.mxu1 %vm264_vm1, %v2192_v6 }
  0x15   : > { %1964 = vmatprep.subr.bf16.mxu1 %v2188_v1  ;;  %1979 = vmatmul.mubr.msk.bf16.vlgmr.msra.gmra.mrb[0].mxu0 %vm264_vm1, %v2195_v9 }
  0x16   : > { %1993 = vmatpush3.bf16.msra.mxu0 %v2201_v10  ;;  %2008 = vmatprep.mubr.msk.bf16.mxu0 %vm2279_vm2, %v2278_v8  ;;  %v2219_v10 = vld [vmem:[%s2690_s3 + $0x88] sm:$0xff]  }
  0x17   : > { %1994 = vmatprep.subr.bf16.mxu0 %v2278_v8 }
  0x18   : > { %1965 = vmatpush3.bf16.msra.mxu1 %v2188_v1 }
  0x19   : > { %2173 = vmatprep.subr.msk.bf16.mxu1 %vm271_vm0, %v2189_v2 }
  0x1a   : > { %1995 = vmatpush3.bf16.msra.mxu0 %v2203_v18 }
  0x1b   : > { %1996 = vmatprep.subr.bf16.mxu0 %v2278_v8 }
  0x1c   : > { %1967 = vmatpush3.bf16.msra.mxu1 %v273_v3 }
  0x1d   : > { %1982 = vmatprep.subr.bf16.mxu1 %v2187_v0 }
  0x1e   : > { %1997 = vmatpush3.bf16.msra.mxu0 %v2205_v20  ;;  %v2227_v20 = vld [vmem:[%s2690_s3 + $0xa8] sm:$0xff]  }
  0x1f   : > { %1969 = vmatmul.mubr.msk.bf16.vlgmr.msra.gmra.mrb[4].mxu1 %vm264_vm1, %v2193_v11  ;;  %1998 = vmatprep.subr.bf16.mxu0 %v2278_v8  ;;  %v2220_v11 = vld [vmem:[%s2690_s3 + $0xe0] sm:$0xff]  }
  0x20   : > { %1983 = vmatpush3.bf16.msra.mxu1 %v2187_v0  ;;  %1988 = vmatprep.mubr.msk.bf16.mxu1 %vm264_vm1, %v2196_v12  ;;  %v2221_v12 = vld [vmem:[%s2690_s3 + $0x90] sm:$0xff]  }
  0x21   : > { %1984 = vmatprep.subr.bf16.mxu1 %v2188_v1 }
  0x22   : > { %1999 = vmatpush3.bf16.msra.mxu0 %v2207_v22  ;;  %v2229_v22 = vld [vmem:[%s2690_s3 + $0xb0] sm:$0xff]  }
  0x23   : > { %2000 = vmatprep.subr.bf16.mxu0 %v2278_v8 }
  0x24   : > { %1985 = vmatpush3.bf16.msra.mxu1 %v2188_v1 }
  0x25   : > { %2175 = vmatprep.subr.msk.bf16.mxu1 %vm271_vm0, %v2189_v2  ;;  %v2217_v2 = vld [vmem:[%s2690_s3 + $0x80] sm:$0xff]  }
  0x26   : > { %2001 = vmatpush3.bf16.msra.mxu0 %v2209_v24  ;;  %v2231_v24 = vld [vmem:[%s2690_s3 + $0xb8] sm:$0xff]  }
  0x27   : > { %2002 = vmatprep.subr.bf16.mxu0 %v2278_v8 }
  0x28   : > { %1987 = vmatpush3.bf16.msra.mxu1 %v273_v3  ;;  %v2218_v3 = vld [vmem:[%s2690_s3 + $0xd8] sm:$0xff]  }
  0x29   : > { %2012 = vmatprep.subr.bf16.mxu1 %v2278_v8 }
  0x2a   : > { %2003 = vmatpush3.bf16.msra.mxu0 %v2211_v26 }
  0x2b   : > { %1989 = vmatmul.mubr.msk.bf16.vlgmr.msra.gmra.mrb[8].mxu1 %vm264_vm1, %v2197_v13  ;;  %2004 = vmatprep.subr.bf16.mxu0 %v2278_v8  ;;  %v2222_v13 = vld [vmem:[%s2690_s3 + $0xe8] sm:$0xff]  }
  0x2c   : > { %2013 = vmatpush3.bf16.msra.mxu1 %v2198_v14  ;;  %2028 = vmatprep.mubr.msk.bf16.mxu1 %vm2279_vm2, %v2278_v8  ;;  %v2223_v14 = vld [vmem:[%s2690_s3 + $0x98] sm:$0xff]  }
  0x2d   : > { %2014 = vmatprep.subr.bf16.mxu1 %v2278_v8 }
  0x2e   : > { %2005 = vmatpush3.bf16.msra.mxu0 %v2213_v27 }
  0x2f   : > { %2006 = vmatprep.subr.bf16.mxu0 %v2278_v8 }
  0x30   : > { %2015 = vmatpush3.bf16.msra.mxu1 %v2199_v15  ;;  %v2224_v15 = vld [vmem:[%s2690_s3 + $0xf0] sm:$0xff]  }
  0x31   : > { %2016 = vmatprep.subr.bf16.mxu1 %v2278_v8 }
  0x32   : > { %2007 = vmatpush3.bf16.msra.mxu0 %v2215_v28  ;;  %v2233_v28 = vld [vmem:[%s2690_s3 + $0x100] sm:$0xff]  }
  0x33   : > { %2032 = vmatprep.subr.bf16.mxu0 %v2278_v8 }
  0x34   : > { %2017 = vmatpush3.bf16.msra.mxu1 %v2200_v16  ;;  %v2225_v16 = vld [vmem:[%s2690_s3 + $0xa0] sm:$0xff]  }
  0x35   : > { %2018 = vmatprep.subr.bf16.mxu1 %v2278_v8 }
  0x38   : > { %2019 = vmatpush3.bf16.msra.mxu1 %v2202_v17  ;;  %v2226_v17 = vld [vmem:[%s2690_s3 + $0xf8] sm:$0xff]  }
  0x39   : > { %2020 = vmatprep.subr.bf16.mxu1 %v2278_v8 }
  0x3c   : > { %2021 = vmatpush3.bf16.msra.mxu1 %v2204_v19 }
  0x3d   : > { %2022 = vmatprep.subr.bf16.mxu1 %v2278_v8 }
  0x40   : > { %2023 = vmatpush3.bf16.msra.mxu1 %v2206_v21  ;;  %v2228_v21 = vld [vmem:[%s2690_s3 + $0x140] sm:$0xff]  }
  0x41   : > { %2024 = vmatprep.subr.bf16.mxu1 %v2278_v8 }
  0x44   : > { %2025 = vmatpush3.bf16.msra.mxu1 %v2208_v23  ;;  %v2230_v23 = vld [vmem:[%s2690_s3 + $0x148] sm:$0xff]  }
  0x45   : > { %2026 = vmatprep.subr.bf16.mxu1 %v2278_v8 }
  0x48   : > { %2027 = vmatpush3.bf16.msra.mxu1 %v2210_v25  ;;  %v2232_v25 = vld [vmem:[%s2690_s3 + $0x150] sm:$0xff]  }
  0x49   : > { %2052 = vmatprep.subr.bf16.mxu1 %v2278_v8 }
  0xe6   : > { %v1960_v30 = vpop.f32.mrb[0].mxu1 }
  0xe7   : > { %v318_v31 = vadd.f32 %v1960_v30, %v1618_v29  ;;  %v309_v32 = vpop.f32.mrb[1].mxu1 }
  0xe8   : > { %v310_v33 = vadd.f32 %v1618_v29, %v309_v32  ;;  %v1961_v34 = vpop.f32.mrb[2].mxu1  ;;  %v1980_v35 = vpop.f32.mrb[0].mxu0  ;;  %v2236_v32 = vld [vmem:[%s2690_s3 + $0x160] sm:$0xff]  }
  0xe9   : > { %v325_v36 = vmax.f32 %v318_v31, 0.0  ;;  %v312_v37 = vpop.f32.mrb[3].mxu1  ;;  %v454_v38 = vpop.f32.mrb[1].mxu0  ;;  %v2235_v31 = vld [vmem:[%s2690_s3 + $0x108] sm:$0xff]   ;;  %v2239_v35 = vld [vmem:[%s2690_s3 + $0x118] sm:$0xff]  }
  0xea   : > { %v323_v39 = vmax.f32 %v310_v33, 0.0  ;;  %v313_v40 = vadd.f32 %v1618_v29, %v312_v37  ;;  %v2429_v41 = vadd.f32 %v1618_v29, %v454_v38  ;;  %v1981_v42 = vpop.f32.mrb[2].mxu0  ;;  %v2237_v33 = vld [vmem:[%s2690_s3 + $0x110] sm:$0xff]   ;;  %v2238_v34 = vld [vmem:[%s2690_s3 + $0x168] sm:$0xff]   ;;  %v2241_v37 = vld [vmem:[%s2690_s3 + $0x120] sm:$0xff]  }
  0xeb   : > { %328 = vst [vmem:[#allocation2 + $0x10] sm:$0xf] %v325_v36  ;;  %v457_v43 = vpop.f32.mrb[3].mxu0  ;;  %v2240_v36 = vld [vmem:[%s2690_s3 + $0x170] sm:$0xff]   ;;  %v2242_v38 = vld [vmem:[%s2690_s3 + $0x178] sm:$0xff]   ;;  %v2243_v42 = vld [vmem:[%s2690_s3 + $0x128] sm:$0xff]  }
  0xec   : > { %326 = vst [vmem:[#allocation2] sm:$0xff] %v323_v39  ;;  %v324_v44 = vmax.f32 %v313_v40, 0.0  ;;  %v468_v45 = vmax.f32 %v2429_v41, 0.0  ;;  %v458_v46 = vadd.f32 %v1618_v29, %v457_v43  ;;  %v2244_v43 = vld [vmem:[%s2690_s3 + $0x1c0] sm:$0xff]  }
  0xee   : > { %327 = vst [vmem:[#allocation2 + $0x8] sm:$0xff] %v324_v44  ;;  %472 = vst [vmem:[#allocation2 + $0x30] sm:$0xff] %v468_v45  ;;  %v469_v47 = vmax.f32 %v458_v46, 0.0  ;;  %v2245_v44 = vld [vmem:[%s2690_s3 + $0x130] sm:$0xff]   ;;  %v2247_v46 = vld [vmem:[%s2690_s3 + $0x138] sm:$0xff]  }
  0xf0   : > { %473 = vst [vmem:[#allocation2 + $0x38] sm:$0xff] %v469_v47  ;;  %v2248_v47 = vld [vmem:[%s2690_s3 + $0x1d0] sm:$0xff]  }
  0xf2   : > { %v1970_v48 = vpop.f32.mrb[4].mxu1 }
  0xf3   : > { %v381_v49 = vpop.f32.mrb[5].mxu1 }
  0xf4   : > { %v382_v50 = vadd.f32 %v1618_v29, %v381_v49  ;;  %v1971_v51 = vpop.f32.mrb[6].mxu1  ;;  %v2249_v49 = vld [vmem:[%s2690_s3 + $0x180] sm:$0xff]  }
  0xf5   : > { %v384_v52 = vpop.f32.mrb[7].mxu1  ;;  %v549_v53 = vld [vmem:[#allocation2 + $0x8] sm:$0xf] }
  0xf6   : > { %v395_v55 = vmax.f32 %v382_v50, 0.0  ;;  %v385_v56 = vadd.f32 %v1618_v29, %v384_v52  ;;  %v550_v57 = vpack.c.bf16 %v549_v53, %v323_v39  ;;  %v765_v26 = vld [vmem:[#allocation2 + $0x1] sm:$0xff]  ;;  %v766_v27 = vld [vmem:[#allocation2 + $0x9] sm:$0xf]  ;;  %v2250_v50 = vld [vmem:[%s2690_s3 + $0x1d8] sm:$0xff]  }
  0xf7   : > { %v877_v18 = vld [vmem:[#allocation2 + $0x38] sm:$0xf]  ;;  %v767_v30 = vpack.c.bf16 %v766_v27, %v765_v26  ;;  %v2251_v52 = vld [vmem:[%s2690_s3 + $0x188] sm:$0xff]   ;;  %v2252_v53 = vld [vmem:[%s2690_s3 + $0x1e0] sm:$0xff]  }
  0xf8   : > { %399 = vst [vmem:[#allocation2 + $0x18] sm:$0xff] %v395_v55  ;;  %v396_v58 = vmax.f32 %v385_v56, 0.0  ;;  %2029 = vmatmul.mubr.bf16.vlgmr.msra.gmra.mrb[12].mxu1 %v550_v57  ;;  %v878_v19 = vpack.c.bf16 %v877_v18, %v468_v45  ;;  %v1098_v39 = vld [vmem:[#allocation2 + $0x31] sm:$0xff]  ;;  %v1099_v40 = vld [vmem:[#allocation2 + $0x39] sm:$0xf]  ;;  %v2246_v45 = vld [vmem:[%s2690_s3 + $0x1c8] sm:$0xff]  }
  0xf9   : > { %2053 = vmatpush3.bf16.msra.mxu1 %v2212_v54  ;;  %2068 = vmatprep.mubr.msk.bf16.mxu1 %vm2279_vm2, %v2278_v8  ;;  %v1100_v41 = vpack.c.bf16 %v1099_v40, %v1098_v39  ;;  %v2253_v54 = vld [vmem:[%s2690_s3 + $0x190] sm:$0xff]   ;;  %v2255_v56 = vld [vmem:[%s2690_s3 + $0x198] sm:$0xff]  }
  0xfa   : > { %400 = vst [vmem:[#allocation2 + $0x20] sm:$0xff] %v396_v58  ;;  %2054 = vmatprep.subr.bf16.mxu1 %v2278_v8  ;;  %v2256_v57 = vld [vmem:[%s2690_s3 + $0x1f0] sm:$0xff]   ;;  %v2257_v58 = vld [vmem:[%s2690_s3 + $0x1a0] sm:$0xff]  }
  0xfd   : > { %2055 = vmatpush3.bf16.msra.mxu1 %v2214_v59  ;;  %v2258_v59 = vld [vmem:[%s2690_s3 + $0x1f8] sm:$0xff]  }
  0xfe   : > { %2056 = vmatprep.subr.bf16.mxu1 %v2278_v8  ;;  %v1990_v61 = vpop.f32.mrb[8].mxu1 }
  0xff   : > { %v527_v62 = vpop.f32.mrb[9].mxu1 }
 0x100   : > { %v2447_v63 = vadd.f32 %v1618_v29, %v527_v62  ;;  %v1991_v0 = vpop.f32.mrb[10].mxu1  ;;  %v2259_v62 = vld [vmem:[%s2690_s3 + $0x1a8] sm:$0xff]  }
 0x101   : > { %2057 = vmatpush3.bf16.msra.mxu1 %v2216_v60  ;;  %v568_v1 = vld [vmem:[#allocation2 + $0x20] sm:$0xf]  ;;  %v530_v4 = vpop.f32.mrb[11].mxu1  ;;  %v1321_v61 = vld [vmem:[#allocation2 + $0x24] sm:$0xf]  ;;  %v2260_v0 = vld [vmem:[%s2690_s3 + $0x1b0] sm:$0xff]  }
 0x102   : > { %2058 = vmatprep.subr.bf16.mxu1 %v2278_v8  ;;  %v569_v5 = vpack.c.bf16 %v568_v1, %v395_v55  ;;  %v541_v6 = vmax.f32 %v2447_v63, 0.0  ;;  %v531_v7 = vadd.f32 %v1618_v29, %v530_v4  ;;  %v2234_v29 = vld [vmem:[%s2690_s3 + $0x158] sm:$0xff]   ;;  %v2254_v55 = vld [vmem:[%s2690_s3 + $0x1e8] sm:$0xff]   ;;  %v2262_v4 = vld [vmem:[%s2690_s3 + $0x200] sm:$0xff]  }
 0x103   : > { %v1320_v60 = vld [vmem:[#allocation2 + $0x1c] sm:$0xff] }
 0x104   : > { %2009 = vmatmul.mubr.bf16.vlgmr.msra.gmra.mrb[4].mxu0 %v569_v5  ;;  %v542_v9 = vmax.f32 %v531_v7, 0.0  ;;  %v1322_v63 = vpack.c.bf16 %v1321_v61, %v1320_v60  ;;  %v2261_v1 = vld [vmem:[%s2690_s3 + $0x1b8] sm:$0xff]   ;;  %v2264_v7 = vld [vmem:[%s2690_s3 + $0x210] sm:$0xff]  }
 0x105   : > { %2033 = vmatpush3.bf16.msra.mxu0 %v2217_v2  ;;  %2059 = vmatpush3.bf16.msra.mxu1 %v2218_v3  ;;  %v1209_v2 = vld [vmem:[#allocation2 + $0x4] sm:$0xff]  ;;  %v1210_v3 = vld [vmem:[#allocation2 + $0xc] sm:$0xf] }
 0x106   : > { %2034 = vmatprep.subr.bf16.mxu0 %v2278_v8  ;;  %2060 = vmatprep.subr.bf16.mxu1 %v2278_v8  ;;  %546 = vst [vmem:[#allocation2 + $0x50] sm:$0xff] %v542_v9  ;;  %v1211_v5 = vpack.c.bf16 %v1210_v3, %v1209_v2  ;;  %v2265_v9 = vld [vmem:[%s2690_s3 + $0x218] sm:$0xff]  }
 0x107   : > { %2048 = vmatprep.mubr.msk.bf16.mxu0 %vm2279_vm2, %v2278_v8 }
 0x109   : > { %2035 = vmatpush3.bf16.msra.mxu0 %v2219_v10  ;;  %2061 = vmatpush3.bf16.msra.mxu1 %v2220_v11  ;;  %v2266_v10 = vld [vmem:[%s2690_s3 + $0x220] sm:$0xff]   ;;  %v2267_v11 = vld [vmem:[%s2690_s3 + $0x228] sm:$0xff]  }
 0x10a   : > { %2036 = vmatprep.subr.bf16.mxu0 %v2278_v8  ;;  %2062 = vmatprep.subr.bf16.mxu1 %v2278_v8 }
 0x10d   : > { %2037 = vmatpush3.bf16.msra.mxu0 %v2221_v12  ;;  %2063 = vmatpush3.bf16.msra.mxu1 %v2222_v13  ;;  %v988_v48 = vld [vmem:[#allocation2 + $0x50] sm:$0xf]  ;;  %v2269_v13 = vld [vmem:[%s2690_s3 + $0x238] sm:$0xff]  }
 0x10e   : > { %2038 = vmatprep.subr.bf16.mxu0 %v2278_v8  ;;  %2064 = vmatprep.subr.bf16.mxu1 %v2278_v8  ;;  %v989_v51 = vpack.c.bf16 %v988_v48, %v541_v6  ;;  %v2263_v6 = vld [vmem:[%s2690_s3 + $0x208] sm:$0xff]   ;;  %v2268_v12 = vld [vmem:[%s2690_s3 + $0x230] sm:$0xff]  }
 0x111   : > { %2039 = vmatpush3.bf16.msra.mxu0 %v2223_v14  ;;  %2065 = vmatpush3.bf16.msra.mxu1 %v2224_v15  ;;  %v1431_v14 = vld [vmem:[#allocation2 + $0x5] sm:$0xff]  ;;  %v1432_v15 = vld [vmem:[#allocation2 + $0xd] sm:$0xf] }
 0x112   : > { %2040 = vmatprep.subr.bf16.mxu0 %v2278_v8  ;;  %2066 = vmatprep.subr.bf16.mxu1 %v2278_v8 }
 0x115   : > { %2041 = vmatpush3.bf16.msra.mxu0 %v2225_v16  ;;  %2067 = vmatpush3.bf16.msra.mxu1 %v2226_v17  ;;  %v1433_v16 = vpack.c.bf16 %v1432_v15, %v1431_v14 }
 0x116   : > { %2042 = vmatprep.subr.bf16.mxu0 %v2278_v8  ;;  %2092 = vmatprep.subr.bf16.mxu1 %v2278_v8 }
 0x118   : > { %2069 = vmatmul.mubr.bf16.vlgmr.msra.gmra.mrb[16].mxu1 %v878_v19 }
 0x119   : > { %2043 = vmatpush3.bf16.msra.mxu0 %v2227_v20  ;;  %2093 = vmatpush3.bf16.msra.mxu1 %v2228_v21 }
 0x11a   : > { %2044 = vmatprep.subr.bf16.mxu0 %v2278_v8  ;;  %2094 = vmatprep.subr.bf16.mxu1 %v2278_v8 }
 0x11b   : > { %2108 = vmatprep.mubr.msk.bf16.mxu1 %vm2279_vm2, %v2278_v8 }
 0x11d   : > { %2045 = vmatpush3.bf16.msra.mxu0 %v2229_v22  ;;  %2095 = vmatpush3.bf16.msra.mxu1 %v2230_v23 }
 0x11e   : > { %2046 = vmatprep.subr.bf16.mxu0 %v2278_v8  ;;  %2096 = vmatprep.subr.bf16.mxu1 %v2278_v8 }
 0x121   : > { %2047 = vmatpush3.bf16.msra.mxu0 %v2231_v24  ;;  %2097 = vmatpush3.bf16.msra.mxu1 %v2232_v25 }
 0x122   : > { %2072 = vmatprep.subr.bf16.mxu0 %v2278_v8  ;;  %2098 = vmatprep.subr.bf16.mxu1 %v2278_v8 }
 0x124   : > { %2049 = vmatmul.mubr.bf16.vlgmr.msra.gmra.mrb[8].mxu0 %v767_v30 }
 0x125   : > { %2073 = vmatpush3.bf16.msra.mxu0 %v2233_v28  ;;  %2099 = vmatpush3.bf16.msra.mxu1 %v2234_v29 }
 0x126   : > { %2074 = vmatprep.subr.bf16.mxu0 %v2278_v8  ;;  %2100 = vmatprep.subr.bf16.mxu1 %v2278_v8 }
 0x127   : > { %2088 = vmatprep.mubr.msk.bf16.mxu0 %vm2279_vm2, %v2278_v8 }
 0x129   : > { %2075 = vmatpush3.bf16.msra.mxu0 %v2235_v31  ;;  %2101 = vmatpush3.bf16.msra.mxu1 %v2236_v32 }
 0x12a   : > { %2076 = vmatprep.subr.bf16.mxu0 %v2278_v8  ;;  %2102 = vmatprep.subr.bf16.mxu1 %v2278_v8 }
 0x12d   : > { %2077 = vmatpush3.bf16.msra.mxu0 %v2237_v33  ;;  %2103 = vmatpush3.bf16.msra.mxu1 %v2238_v34 }
 0x12e   : > { %2078 = vmatprep.subr.bf16.mxu0 %v2278_v8  ;;  %2104 = vmatprep.subr.bf16.mxu1 %v2278_v8 }
 0x131   : > { %2079 = vmatpush3.bf16.msra.mxu0 %v2239_v35  ;;  %2105 = vmatpush3.bf16.msra.mxu1 %v2240_v36 }
 0x132   : > { %2080 = vmatprep.subr.bf16.mxu0 %v2278_v8  ;;  %2106 = vmatprep.subr.bf16.mxu1 %v2278_v8 }
 0x135   : > { %2081 = vmatpush3.bf16.msra.mxu0 %v2241_v37  ;;  %2107 = vmatpush3.bf16.msra.mxu1 %v2242_v38 }
 0x136   : > { %2082 = vmatprep.subr.bf16.mxu0 %v2278_v8  ;;  %2132 = vmatprep.subr.bf16.mxu1 %v2278_v8 }
 0x138   : > { %2109 = vmatmul.mubr.bf16.vlgmr.msra.gmra.mrb[20].mxu1 %v1100_v41 }
 0x139   : > { %2083 = vmatpush3.bf16.msra.mxu0 %v2243_v42  ;;  %2133 = vmatpush3.bf16.msra.mxu1 %v2244_v43 }
 0x13a   : > { %2084 = vmatprep.subr.bf16.mxu0 %v2278_v8  ;;  %2134 = vmatprep.subr.bf16.mxu1 %v2278_v8 }
 0x13b   : > { %2148 = vmatprep.mubr.msk.bf16.mxu1 %vm2279_vm2, %v2278_v8 }
 0x13d   : > { %2085 = vmatpush3.bf16.msra.mxu0 %v2245_v44  ;;  %2135 = vmatpush3.bf16.msra.mxu1 %v2246_v45 }
 0x13e   : > { %2086 = vmatprep.subr.bf16.mxu0 %v2278_v8  ;;  %2136 = vmatprep.subr.bf16.mxu1 %v2278_v8 }
 0x141   : > { %2087 = vmatpush3.bf16.msra.mxu0 %v2247_v46  ;;  %2137 = vmatpush3.bf16.msra.mxu1 %v2248_v47 }
 0x142   : > { %2112 = vmatprep.subr.bf16.mxu0 %v2278_v8  ;;  %2138 = vmatprep.subr.bf16.mxu1 %v2278_v8 }
 0x144   : > { %2089 = vmatmul.mubr.bf16.vlgmr.msra.gmra.mrb[12].mxu0 %v989_v51 }
 0x145   : > { %2113 = vmatpush3.bf16.msra.mxu0 %v2249_v49  ;;  %2139 = vmatpush3.bf16.msra.mxu1 %v2250_v50 }
 0x146   : > { %2114 = vmatprep.subr.bf16.mxu0 %v2278_v8  ;;  %2140 = vmatprep.subr.bf16.mxu1 %v2278_v8 }
 0x147   : > { %2128 = vmatprep.mubr.msk.bf16.mxu0 %vm2279_vm2, %v2278_v8 }
 0x149   : > { %2115 = vmatpush3.bf16.msra.mxu0 %v2251_v52  ;;  %2141 = vmatpush3.bf16.msra.mxu1 %v2252_v53 }
 0x14a   : > { %2116 = vmatprep.subr.bf16.mxu0 %v2278_v8  ;;  %2142 = vmatprep.subr.bf16.mxu1 %v2278_v8 }
 0x14d   : > { %2117 = vmatpush3.bf16.msra.mxu0 %v2253_v54  ;;  %2143 = vmatpush3.bf16.msra.mxu1 %v2254_v55 }
 0x14e   : > { %2118 = vmatprep.subr.bf16.mxu0 %v2278_v8  ;;  %2144 = vmatprep.subr.bf16.mxu1 %v2278_v8 }
 0x151   : > { %2119 = vmatpush3.bf16.msra.mxu0 %v2255_v56  ;;  %2145 = vmatpush3.bf16.msra.mxu1 %v2256_v57 }
 0x152   : > { %2120 = vmatprep.subr.bf16.mxu0 %v2278_v8  ;;  %2146 = vmatprep.subr.bf16.mxu1 %v2278_v8 }
 0x155   : > { %2121 = vmatpush3.bf16.msra.mxu0 %v2257_v58  ;;  %2147 = vmatpush3.bf16.msra.mxu1 %v2258_v59 }
 0x156   : > { %2122 = vmatprep.subr.bf16.mxu0 %v2278_v8 }
 0x158   : > { %2149 = vmatmul.mubr.bf16.vlgmr.msra.gmra.mrb[24].mxu1 %v1322_v63  ;;  %v1847_v63 = vld [vmem:[%s2691_s4] ss:$0 sm:$0xff] }
 0x159   : > { %2123 = vmatpush3.bf16.msra.mxu0 %v2259_v62 }
 0x15a   : > { %2124 = vmatprep.subr.bf16.mxu0 %v2278_v8 }
 0x15d   : > { %2125 = vmatpush3.bf16.msra.mxu0 %v2260_v0 }
 0x15e   : > { %2126 = vmatprep.subr.bf16.mxu0 %v2278_v8 }
 0x161   : > { %2127 = vmatpush3.bf16.msra.mxu0 %v2261_v1 }
 0x162   : > { %2152 = vmatprep.subr.bf16.mxu0 %v2278_v8 }
 0x164   : > { %2129 = vmatmul.mubr.bf16.vlgmr.msra.gmra.mrb[16].mxu0 %v1211_v5 }
 0x165   : > { %2153 = vmatpush3.bf16.msra.mxu0 %v2262_v4  ;;  %2168 = vmatprep.mubr.msk.bf16.mxu0 %vm2279_vm2, %v2278_v8 }
 0x166   : > { %2154 = vmatprep.subr.bf16.mxu0 %v2278_v8 }
 0x169   : > { %2155 = vmatpush3.bf16.msra.mxu0 %v2263_v6 }
 0x16a   : > { %2156 = vmatprep.subr.bf16.mxu0 %v2278_v8 }
 0x16d   : > { %2157 = vmatpush3.bf16.msra.mxu0 %v2264_v7 }
 0x16e   : > { %2158 = vmatprep.subr.bf16.mxu0 %v2278_v8 }
 0x171   : > { %2159 = vmatpush3.bf16.msra.mxu0 %v2265_v9 }
 0x172   : > { %2160 = vmatprep.subr.bf16.mxu0 %v2278_v8 }
 0x175   : > { %2161 = vmatpush3.bf16.msra.mxu0 %v2266_v10 }
 0x176   : > { %2162 = vmatprep.subr.bf16.mxu0 %v2278_v8 }
 0x179   : > { %2163 = vmatpush3.bf16.msra.mxu0 %v2267_v11 }
 0x17a   : > { %2164 = vmatprep.subr.bf16.mxu0 %v2278_v8 }
 0x17d   : > { %2165 = vmatpush3.bf16.msra.mxu0 %v2268_v12 }
 0x17e   : > { %2166 = vmatprep.subr.bf16.mxu0 %v2278_v8 }
 0x181   : > { %2167 = vmatpush3.bf16.msra.mxu0 %v2269_v13 }
 0x184   : > { %2169 = vmatmul.mubr.bf16.vlgmr.msra.gmra.mrb[20].mxu0 %v1433_v16 }
 0x1cb   : > { %v758_v17 = vpop.f32.mrb[12].mxu1 }
 0x1cc   : > { %v2030_v18 = vpop.f32.mrb[13].mxu1 }
 0x1cd   : > { %v761_v19 = vpop.f32.mrb[14].mxu1 }
 0x1ce   : > { %v2031_v20 = vpop.f32.mrb[15].mxu1 }
 0x1d7   : > { %v669_v21 = vpop.f32.mrb[4].mxu0 }
 0x1d8   : > { %v759_v22 = vadd.f32 %v758_v17, %v669_v21  ;;  %v2010_v23 = vpop.f32.mrb[5].mxu0 }
 0x1d9   : > { %v672_v24 = vpop.f32.mrb[6].mxu0 }
 0x1da   : > { %v762_v25 = vadd.f32 %v761_v19, %v672_v24  ;;  %v2011_v26 = vpop.f32.mrb[7].mxu0 }
 0x1eb   : > { %v978_v27 = vpop.f32.mrb[16].mxu1 }
 0x1ec   : > { %v2070_v28 = vpop.f32.mrb[17].mxu1 }
 0x1ed   : > { %v981_v29 = vpop.f32.mrb[18].mxu1 }
 0x1ee   : > { %v2071_v30 = vpop.f32.mrb[19].mxu1 }
 0x1f7   : > { %v867_v8 = vpop.f32.mrb[8].mxu0 }
 0x1f8   : > { %v874_v31 = vadd.f32 %v867_v8, %v759_v22  ;;  %v2050_v32 = vpop.f32.mrb[9].mxu0 }
 0x1f9   : > { %v870_v33 = vpop.f32.mrb[10].mxu0 }
 0x1fa   : > { %v875_v34 = vadd.f32 %v870_v33, %v762_v25  ;;  %v985_v35 = vadd.f32 %v978_v27, %v874_v31  ;;  %v2051_v36 = vpop.f32.mrb[11].mxu0 }
 0x1fc   : > { %v986_v37 = vadd.f32 %v981_v29, %v875_v34 }
 0x20b   : > { %v1200_v38 = vpop.f32.mrb[20].mxu1 }
 0x20c   : > { %v2110_v39 = vpop.f32.mrb[21].mxu1 }
 0x20d   : > { %v1203_v40 = vpop.f32.mrb[22].mxu1 }
 0x20e   : > { %v2111_v41 = vpop.f32.mrb[23].mxu1 }
 0x217   : > { %v1089_v42 = vpop.f32.mrb[12].mxu0 }
 0x218   : > { %v1096_v43 = vadd.f32 %v1089_v42, %v985_v35  ;;  %v2090_v44 = vpop.f32.mrb[13].mxu0 }
 0x219   : > { %v1092_v45 = vpop.f32.mrb[14].mxu0 }
 0x21a   : > { %v1097_v46 = vadd.f32 %v1092_v45, %v986_v37  ;;  %v2091_v47 = vpop.f32.mrb[15].mxu0  ;;  %v1207_v48 = vadd.f32 %v1200_v38, %v1096_v43 }
 0x21c   : > { %v1208_v49 = vadd.f32 %v1203_v40, %v1097_v46 }
 0x22b   : > { %v1422_v50 = vpop.f32.mrb[24].mxu1 }
 0x22c   : > { %v2150_v51 = vpop.f32.mrb[25].mxu1 }
 0x22d   : > { %v1425_v52 = vpop.f32.mrb[26].mxu1 }
 0x22e   : > { %v2151_v53 = vpop.f32.mrb[27].mxu1 }
 0x237   : > { %v1311_v54 = vpop.f32.mrb[16].mxu0 }
 0x238   : > { %v1318_v55 = vadd.f32 %v1311_v54, %v1207_v48  ;;  %v2130_v56 = vpop.f32.mrb[17].mxu0 }
 0x239   : > { %v1314_v57 = vpop.f32.mrb[18].mxu0 }
 0x23a   : > { %v1319_v58 = vadd.f32 %v1314_v57, %v1208_v49  ;;  %v2131_v59 = vpop.f32.mrb[19].mxu0  ;;  %v1429_v60 = vadd.f32 %v1422_v50, %v1318_v55 }
 0x23c   : > { %v1430_v61 = vadd.f32 %v1425_v52, %v1319_v58 }
 0x257   : > { %v1533_v62 = vpop.f32.mrb[20].mxu0 }
 0x258   : > { %v1540_v0 = vadd.f32 %v1533_v62, %v1429_v60  ;;  %v2170_v1 = vpop.f32.mrb[21].mxu0 }
 0x259   : > { %v1536_v2 = vpop.f32.mrb[22].mxu0 }
 0x25a   : > { %v1549_v3 = vadd.f32 %v1847_v63, %v1540_v0  ;;  %v1541_v4 = vadd.f32 %v1536_v2, %v1430_v61  ;;  %v2171_v5 = vpop.f32.mrb[23].mxu0 }
 0x25c   : > { %v1551_v6 = vmax.f32 %v1549_v3, 0.0  ;;  %v1550_v7 = vadd.f32 %v1847_v63, %v1541_v4 }
 0x25e   : > { %1553 = vst [vmem:[%s224_s20] sm:$0xff] %v1551_v6  ;;  %v1552_v9 = vmax.f32 %v1550_v7, 0.0 }
 0x260   : > { %1554 = vst [vmem:[%s224_s20 + $0x8] sm:$0xf] %v1552_v9 }
 0x261 PF: > { %s15_s18 = sadd.s32 1, %s2276_s18  }
 0x262   : > { %p12_p4 = scmp.ge.s32.totalorder %s15_s18, 4  }
 0x264   :  { %14 = sbr.rel (!%p12_p4) target bundleno = 1 (0x1), region = 84 }

</bundles_post_ra>
